<compile_context>
chip_gen: v7x
topology: tpu7x:2x2x1
jax: 0.10.0
libtpu: 0.0.40
codegen_flags: <defaults>
</compile_context>

<pallas_src>
import functools

import jax
import jax.numpy as jnp
from jax.experimental import pallas as pl
from jax.experimental.pallas import tpu as pltpu

_NEG_INF = -1e30


def _layernorm(x, gamma, beta, eps=1e-5):
    mu = jnp.mean(x, axis=-1, keepdims=True)
    var = jnp.mean((x - mu) ** 2, axis=-1, keepdims=True)
    return (x - mu) * jax.lax.rsqrt(var + eps) * gamma + beta


# --------------------------------------------------------------------------
# Stage 1: fused QKV projection (computed exactly once per token)
# --------------------------------------------------------------------------
def qkv_proj_kernel(x_ref, wqkv_ref, q_ref, k_ref, v_ref):
    e = x_ref.shape[-1]
    r = jnp.dot(x_ref[...].astype(jnp.bfloat16), wqkv_ref[...],
                preferred_element_type=jnp.float32)            # (TMP, 3E) f32 acc
    q_ref[...] = r[:, :e].astype(q_ref.dtype)
    k_ref[...] = r[:, e:2 * e].astype(k_ref.dtype)
    v_ref[...] = r[:, 2 * e:].astype(v_ref.dtype)


# --------------------------------------------------------------------------
# Stage 2: attention (per query-row tile, per-head lane slices) + FFN
# --------------------------------------------------------------------------
def attn_ffn_kernel(
    x_ref, q_ref, k_ref, v_ref,
    wo_ref, bo_ref, g1_ref, be1_ref,
    wf1_ref, bf1_ref, wf2_ref, bf2_ref,
    g2_ref, be2_ref,
    o_ref, ctx_ref,
    *, heads, mask,
):
    x_rows = x_ref[0].astype(jnp.float32)      # (TM, E) residual, f32
    q = q_ref[0]                               # (TM, E) bf16, already scaled
    k = k_ref[0]                               # (T,  E) bf16 (full sequence)
    v = v_ref[0]                               # (T,  E) bf16 (full sequence)
    tm, e = q.shape
    t = k.shape[0]
    s = e // heads

    if mask:
        # causal-mask bias built once per tile, shared by every head
        row0 = pl.program_id(1) * tm
        rows = row0 + jax.lax.broadcasted_iota(jnp.int32, (tm, t), 0)
        cols = jax.lax.broadcasted_iota(jnp.int32, (tm, t), 1)
        bias = jnp.where(cols <= rows, 0.0, _NEG_INF)          # (TM, T) f32

    # per-head attention: score working set is a single (TM, T) f32 tile
    for h in range(heads):
        sl = slice(h * s, (h + 1) * s)
        qh = q[:, sl]                                          # (TM, S) bf16
        kh = k[:, sl]                                          # (T,  S) bf16
        vh = v[:, sl]                                          # (T,  S) bf16
        # contraction over the last axes -> no k.T materialization
        scores = jax.lax.dot_general(
            qh, kh, (((1,), (1,)), ((), ())),
            preferred_element_type=jnp.float32)                # (TM, T) f32
        if mask:
            scores = scores + bias
        scores = scores - jnp.max(scores, axis=-1, keepdims=True)
        p = jnp.exp(scores)                                    # f32 softmax
        p = p / jnp.sum(p, axis=-1, keepdims=True)             # exact divide
        ctx = jnp.dot(p.astype(jnp.bfloat16), vh,
                      preferred_element_type=jnp.float32)      # (TM, S) f32
        ctx_ref[:, sl] = ctx.astype(ctx_ref.dtype)             # lane-slice write

    # single (TM,E)@(E,E) output projection (contraction over full E)
    attended = jnp.dot(ctx_ref[...], wo_ref[...],
                       preferred_element_type=jnp.float32) + bo_ref[...]

    # residual + LayerNorm 1 (f32)
    x1 = _layernorm(attended + x_rows, g1_ref[...], be1_ref[...])

    # feed-forward: Linear -> ReLU -> Linear (bf16 MXU operands, f32 acc)
    h1 = jnp.dot(x1.astype(jnp.bfloat16), wf1_ref[...],
                 preferred_element_type=jnp.float32) + bf1_ref[...]
    h1 = jnp.maximum(h1, 0.0)
    ff = jnp.dot(h1.astype(jnp.bfloat16), wf2_ref[...],
                 preferred_element_type=jnp.float32) + bf2_ref[...]

    # residual + LayerNorm 2 (f32)
    x2 = _layernorm(ff + x1, g2_ref[...], be2_ref[...])
    o_ref[0] = x2.astype(o_ref.dtype)


# --------------------------------------------------------------------------
# Tiling helpers
# --------------------------------------------------------------------------
def _pick_tile(n, cap):
    cap = max(1, min(n, cap))
    for d in range(cap, 0, -1):
        if n % d == 0:
            return d
    return n


def _pick_row_block(t):
    # keep the per-head (TM, T) f32 score tile <= ~4 MiB, TM <= 512
    cap = max(128, (4 * 1024 * 1024) // (4 * max(t, 1)))
    return _pick_tile(t, min(512, cap, t))


# --------------------------------------------------------------------------
# Wrapper
# --------------------------------------------------------------------------
def fmts_transformer_block(x, params, *, heads, mask, row_block=None):
    B, T, E = x.shape
    assert E % heads == 0
    S = E // heads
    H4 = params["wf1"].shape[1]
    scale = 1.0 / (S ** 0.5)

    # ---- trace-time weight repackaging (free): fused & scaled QKV weight,
    #      bf16 copies of the large matmul weights --------------------------
    wqkv = jnp.concatenate(
        [params["wq"] * scale, params["wk"], params["wv"]], axis=1
    ).astype(jnp.bfloat16)                                      # (E, 3E)
    wo_b = params["wo"].astype(jnp.bfloat16)
    wf1_b = params["wf1"].astype(jnp.bfloat16)
    wf2_b = params["wf2"].astype(jnp.bfloat16)

    # ---- stage 1: QKV projection over all B*T rows ------------------------
    x2d = x.reshape(B * T, E)
    TMP = _pick_tile(B * T, 512)
    q2d, k2d, v2d = pl.pallas_call(
        qkv_proj_kernel,
        out_shape=tuple(jax.ShapeDtypeStruct((B * T, E), jnp.bfloat16)
                        for _ in range(3)),
        grid=(B * T // TMP,),
        in_specs=[
            pl.BlockSpec((TMP, E), lambda i: (i, 0)),
            pl.BlockSpec((E, 3 * E), lambda i: (0, 0)),         # resident weight
        ],
        out_specs=tuple(pl.BlockSpec((TMP, E), lambda i: (i, 0))
                        for _ in range(3)),
        compiler_params=pltpu.CompilerParams(
            dimension_semantics=("parallel",),
            vmem_limit_bytes=64 * 1024 * 1024,
        ),
    )(x2d, wqkv)
    q = q2d.reshape(B, T, E)
    k = k2d.reshape(B, T, E)
    v = v2d.reshape(B, T, E)

    # ---- stage 2: attention + FFN, row-tiled -------------------------------
    TM = row_block or _pick_row_block(T)
    assert T % TM == 0, "row_block must divide the sequence length"
    NT = T // TM

    def full(shape):
        # whole-array block with constant block index -> never re-fetched
        return pl.BlockSpec(shape, lambda b, i: (0,) * len(shape))

    kernel = functools.partial(attn_ffn_kernel, heads=heads, mask=mask)

    return pl.pallas_call(
        kernel,
        out_shape=jax.ShapeDtypeStruct((B, T, E), x.dtype),
        grid=(B, NT),
        in_specs=[
            pl.BlockSpec((1, TM, E), lambda b, i: (b, i, 0)),   # x rows (residual)
            pl.BlockSpec((1, TM, E), lambda b, i: (b, i, 0)),   # Q rows
            pl.BlockSpec((1, T, E), lambda b, i: (b, 0, 0)),    # K full sequence
            pl.BlockSpec((1, T, E), lambda b, i: (b, 0, 0)),    # V full sequence
            full((E, E)),            # wo (bf16)
            full((1, E)),            # bo
            full((1, E)), full((1, E)),       # norm1 gamma / beta
            full((E, H4)), full((1, H4)),     # ff linear 1 (bf16 w, f32 b)
            full((H4, E)), full((1, E)),      # ff linear 2 (bf16 w, f32 b)
            full((1, E)), full((1, E)),       # norm2 gamma / beta
        ],
        out_specs=pl.BlockSpec((1, TM, E), lambda b, i: (b, i, 0)),
        scratch_shapes=[pltpu.VMEM((TM, E), jnp.bfloat16)],      # per-tile ctx
        compiler_params=pltpu.CompilerParams(
            dimension_semantics=("parallel", "parallel"),
            vmem_limit_bytes=64 * 1024 * 1024,
        ),
    )(
        x, q, k, v,
        wo_b, params["bo"], params["g1"], params["be1"],
        wf1_b, params["bf1"], wf2_b, params["bf2"],
        params["g2"], params["be2"],
    )


# --------------------------------------------------------------------------
# Pure-JAX reference (mirrors the PyTorch forward, all f32)
# --------------------------------------------------------------------------
def reference(x, p, *, heads, mask):
    B, T, E = x.shape
    S = E // heads
    q = (x @ p["wq"]).reshape(B, T, heads, S)
    k = (x @ p["wk"]).reshape(B, T, heads, S)
    v = (x @ p["wv"]).reshape(B, T, heads, S)
    scores = jnp.einsum("bqhd,bkhd->bhqk", q, k) / jnp.sqrt(S)
    if mask:
        row = jnp.arange(T)[:, None]
        col = jnp.arange(T)[None, :]
        scores = jnp.where(col <= row, scores, -jnp.inf)
    attn = jax.nn.softmax(scores, axis=-1)
    out = jnp.einsum("bhqk,bkhd->bqhd", attn, v).reshape(B, T, E)
    attended = out @ p["wo"] + p["bo"]
    x1 = _layernorm(attended + x, p["g1"], p["be1"])
    ff = jnp.maximum(x1 @ p["wf1"] + p["bf1"], 0.0) @ p["wf2"] + p["bf2"]
    return _layernorm(ff + x1, p["g2"], p["be2"])


def init_params(key, emb, heads, ff_hidden_mult=4):
    hid = ff_hidden_mult * emb
    ks = jax.random.split(key, 6)
    scale = 1.0 / jnp.sqrt(emb)
    return {
        "wq": jax.random.normal(ks[0], (emb, emb), jnp.float32) * scale,
        "wk": jax.random.normal(ks[1], (emb, emb), jnp.float32) * scale,
        "wv": jax.random.normal(ks[2], (emb, emb), jnp.float32) * scale,
        "wo": jax.random.normal(ks[3], (emb, emb), jnp.float32) * scale,
        "bo": jnp.zeros((1, emb), jnp.float32),
        "g1": jnp.ones((1, emb), jnp.float32),
        "be1": jnp.zeros((1, emb), jnp.float32),
        "wf1": jax.random.normal(ks[4], (emb, hid), jnp.float32) * scale,
        "bf1": jnp.zeros((1, hid), jnp.float32),
        "wf2": jax.random.normal(ks[5], (hid, emb), jnp.float32) * (1.0 / jnp.sqrt(hid)),
        "bf2": jnp.zeros((1, emb), jnp.float32),
        "g2": jnp.ones((1, emb), jnp.float32),
        "be2": jnp.zeros((1, emb), jnp.float32),
    }


if __name__ == "__main__":
    key = jax.random.PRNGKey(0)
    # small toy config + a lane-dense config (E multiple of 128) per review
    configs = [(2, 8, 32, 4), (2, 16, 128, 4)]
    for (B, T, EMB, HEADS) in configs:
        kx, kp, key = jax.random.split(key, 3)
        x = jax.random.normal(kx, (B, T, EMB), jnp.float32)
        params = init_params(kp, EMB, HEADS)
        for use_mask in (False, True):
            out = jax.block_until_ready(
                fmts_transformer_block(x, params, heads=HEADS, mask=use_mask))
            ref = reference(x, params, heads=HEADS, mask=use_mask)
            assert out.shape == (B, T, EMB)
            err = float(jnp.max(jnp.abs(out - ref)))
            # tolerance budget: bf16 MXU operands (softmax/LN/residuals stay f32)
            assert jnp.allclose(out, ref, rtol=5e-2, atol=5e-2), (
                B, T, EMB, use_mask, err)
    print("KERNEL_OK")
</pallas_src>

<mosaic_0001>
module attributes {stable_mosaic.version = 11 : i64} {
  func.func @qkv_proj_kernel(%arg0: i32, %arg1: memref<16x32xf32, #tpu.memory_space<vmem>>, %arg2: memref<32x96xbf16, #tpu.memory_space<vmem>>, %arg3: memref<16x32xbf16, #tpu.memory_space<vmem>>, %arg4: memref<16x32xbf16, #tpu.memory_space<vmem>>, %arg5: memref<16x32xbf16, #tpu.memory_space<vmem>>) attributes {dimension_semantics = [#tpu.dimension_semantics<parallel>], iteration_bounds = array<i64: 1>, scalar_prefetch = 0 : i64, scratch_operands = 0 : i64, tpu.core_type = #tpu.core_type<tc>, window_params = [{transform_indices = @transform_0, window_bounds = array<i64: 16, 32>}, {pipeline_mode = #tpu.pipeline_mode<synchronous>, transform_indices = @transform_1, window_bounds = array<i64: 32, 96>}, {transform_indices = @transform_2, window_bounds = array<i64: 16, 32>}, {transform_indices = @transform_3, window_bounds = array<i64: 16, 32>}, {transform_indices = @transform_4, window_bounds = array<i64: 16, 32>}]} {
    %c0 = arith.constant 0 : index
    %c0_0 = arith.constant 0 : index
    %0 = vector.load %arg1[%c0, %c0_0] : memref<16x32xf32, #tpu.memory_space<vmem>>, vector<16x32xf32>
    %1 = arith.truncf %0 : vector<16x32xf32> to vector<16x32xbf16>
    %c0_1 = arith.constant 0 : index
    %c0_2 = arith.constant 0 : index
    %2 = vector.load %arg2[%c0_1, %c0_2] : memref<32x96xbf16, #tpu.memory_space<vmem>>, vector<32x96xbf16>
    %cst = arith.constant dense<0.000000e+00> : vector<16x96xf32>
    %3 = tpu.matmul %1, %2, %cst {dimension_numbers = #tpu.dot_dimension_numbers<[1], [0], [0], [1], [0, 0, 1, 1], [], []>} : vector<16x32xbf16>, vector<32x96xbf16>, vector<16x96xf32> -> vector<16x96xf32>
    %4 = vector.extract_strided_slice %3 {offsets = [0, 0], sizes = [16, 32], strides = [1, 1]} : vector<16x96xf32> to vector<16x32xf32>
    %5 = arith.truncf %4 : vector<16x32xf32> to vector<16x32xbf16>
    %c0_3 = arith.constant 0 : index
    %c0_4 = arith.constant 0 : index
    %6 = vector.load %arg3[%c0_3, %c0_4] : memref<16x32xbf16, #tpu.memory_space<vmem>>, vector<16x32xbf16>
    tpu.vector_store %arg3[%c0_3, %c0_4], %5 {strides = array<i32>} : memref<16x32xbf16, #tpu.memory_space<vmem>>, vector<16x32xbf16>,
    %7 = vector.extract_strided_slice %3 {offsets = [0, 32], sizes = [16, 32], strides = [1, 1]} : vector<16x96xf32> to vector<16x32xf32>
    %8 = arith.truncf %7 : vector<16x32xf32> to vector<16x32xbf16>
    %c0_5 = arith.constant 0 : index
    %c0_6 = arith.constant 0 : index
    %9 = vector.load %arg4[%c0_5, %c0_6] : memref<16x32xbf16, #tpu.memory_space<vmem>>, vector<16x32xbf16>
    tpu.vector_store %arg4[%c0_5, %c0_6], %8 {strides = array<i32>} : memref<16x32xbf16, #tpu.memory_space<vmem>>, vector<16x32xbf16>,
    %10 = vector.extract_strided_slice %3 {offsets = [0, 64], sizes = [16, 32], strides = [1, 1]} : vector<16x96xf32> to vector<16x32xf32>
    %11 = arith.truncf %10 : vector<16x32xf32> to vector<16x32xbf16>
    %c0_7 = arith.constant 0 : index
    %c0_8 = arith.constant 0 : index
    %12 = vector.load %arg5[%c0_7, %c0_8] : memref<16x32xbf16, #tpu.memory_space<vmem>>, vector<16x32xbf16>
    tpu.vector_store %arg5[%c0_7, %c0_8], %11 {strides = array<i32>} : memref<16x32xbf16, #tpu.memory_space<vmem>>, vector<16x32xbf16>,
    return
  }
  func.func @transform_0(%arg0: i32) -> (i32, i32) {
    %c0_i32 = arith.constant 0 : i32
    %c0_i32_0 = arith.constant 0 : i32
    return %arg0, %c0_i32 : i32, i32
  }
  func.func @transform_1(%arg0: i32) -> (i32, i32) {
    %c0_i32 = arith.constant 0 : i32
    %c0_i32_0 = arith.constant 0 : i32
    %c0_i32_1 = arith.constant 0 : i32
    return %c0_i32, %c0_i32_0 : i32, i32
  }
  func.func @transform_2(%arg0: i32) -> (i32, i32) {
    %c0_i32 = arith.constant 0 : i32
    %c0_i32_0 = arith.constant 0 : i32
    return %arg0, %c0_i32 : i32, i32
  }
  func.func @transform_3(%arg0: i32) -> (i32, i32) {
    %c0_i32 = arith.constant 0 : i32
    %c0_i32_0 = arith.constant 0 : i32
    return %arg0, %c0_i32 : i32, i32
  }
  func.func @transform_4(%arg0: i32) -> (i32, i32) {
    %c0_i32 = arith.constant 0 : i32
    %c0_i32_0 = arith.constant 0 : i32
    return %arg0, %c0_i32 : i32, i32
  }
}

</mosaic_0001>

<bundles_post_ra>
// kernel: tpu_custom_call.1
= control target key start
LH: loop header
LB: loop body
LE: loop exit
PB: predicated region body
PF: predicated region fallthrough
CT: control target
= control target key end

     0   :  { %10 = vsyncpa [#allocation3], 0  ;;  %s459_s0 = inlined_call_operand.hbm [shape: f32[16,32], index: 0, kind: input, shape index: {}]   ;;  %s460_s1 = inlined_call_operand.hbm [shape: bf16[32,96], index: 1, kind: input, shape index: {}]   ;;  %s461_s2 = inlined_call_operand.hbm [shape: bf16[16,32], index: 2, kind: output, shape index: {0}]   ;;  %s462_s3 = inlined_call_operand.hbm [shape: bf16[16,32], index: 3, kind: output, shape index: {1}]   ;;  %s463_s4 = inlined_call_operand.hbm [shape: bf16[16,32], index: 4, kind: output, shape index: {2}]  }
   0x1   :  { %11 = vsyncpa [#allocation6], 0 }
   0x2   :  { %12 = vsyncpa [#allocation4], 0 }
   0x3   :  { %13 = vsyncpa [#allocation9], 0  ;;  %s335_s15 = smov [#allocation2]   ;;  %s217_s19 = scalar_lea.hbm %s459_s0, 256 }
   0x4   :  { %s19_s16 = sshll.u32 %s335_s15, 4  ;;  %p218_p0 = scmp.ne.s32.totalorder %s459_s0, %s217_s19  ;;  %s20_s16 = int_to_ptr.vmem [resolvable:$true] %s19_s16 }
   0x5   :  { %p221_p1 = scmp.lt.u32.totalorder %s217_s19, %s459_s0 }
   0x7   :  { %p223_p2 = pnand %p221_p1, %p218_p0 }
   0x9   :  { %226 = shalt.err (!%p223_p2)
}
   0xa   :  { %s227_s24 = scalar_lea.vmem %s20_s16, 256  ;;  %p232_p4 = scmp.lt.s32.totalorder %s20_s16, %s20_s16 }
   0xb   :  { %p228_p3 = scmp.ne.s32.totalorder %s20_s16, %s227_s24  ;;  %p233_p5 = scmp.lt.s32.totalorder %s227_s24, %s227_s24 }
   0xd   :  { %p234_p6 = por %p233_p5, %p232_p4 }
   0xf   :  { %p235_p7 = pnand %p234_p6, %p228_p3 }
  0x11   :  { %238 = shalt.err (!%p235_p7)
}
  0x12   :  { %s336_s25 = smov 128   ;;  %s337_s26 = smov 8  }
  0x13   :  { %25 = dma.hbm_to_vmem [thread:$0]  %s459_s0, 256, %s20_s16, [#allocation3], %s336_s25, %s336_s25, %s337_s26  }
  0x14   :  { %s338_s29 = smov [#allocation5]   ;;  %s239_s7 = scalar_lea.hbm %s460_s1, 256 }
  0x15   :  { %s31_s30 = sshll.u32 %s338_s29, 4  ;;  %p240_p8 = scmp.ne.s32.totalorder %s460_s1, %s239_s7  ;;  %s32_s30 = int_to_ptr.vmem [resolvable:$true] %s31_s30 }
  0x16   :  { %p243_p9 = scmp.lt.u32.totalorder %s239_s7, %s460_s1 }
  0x18   :  { %p245_p10 = pnand %p243_p9, %p240_p8 }
  0x1a   :  { %248 = shalt.err (!%p245_p10)
}
  0x1b   :  { %s249_s12 = scalar_lea.vmem %s32_s30, 256  ;;  %p254_p12 = scmp.lt.s32.totalorder %s32_s30, %s32_s30 }
  0x1c   :  { %p250_p11 = scmp.ne.s32.totalorder %s32_s30, %s249_s12  ;;  %p255_p13 = scmp.lt.s32.totalorder %s249_s12, %s249_s12 }
  0x1e   :  { %p256_p0 = por %p255_p13, %p254_p12 }
  0x20   :  { %p257_p1 = pnand %p256_p0, %p250_p11 }
  0x22   :  { %260 = shalt.err (!%p257_p1)
}
  0x23   :  { %s339_s0 = smov 64   ;;  %s340_s13 = smov 4  }
  0x24   :  { %37 = dma.hbm_to_vmem [thread:$0]  %s460_s1, 256, %s32_s30, [#allocation6], %s339_s0, %s339_s0, %s340_s13  }
  0x25   :  { %327 = dma.done.wait [#allocation3], 256  }
  0x26   :  { %328 = vsyncadd [#allocation3], 4294967040 }
  0x27   :  { %329 = dma.done.wait [#allocation6], 256  }
  0x28   :  { %330 = vsyncadd [#allocation6], 4294967040  ;;  %v341_v0 = vmov 0.0   ;;  %vm342_vm0 = vmmov 0   ;;  %v215_v1 = vld [vmem:[#allocation5] sm:$0xff]   ;;  %v216_v2 = vld [vmem:[#allocation5 + $0x8] sm:$0xff]  }
  0x29   :  { %195 = vmatprep.subr.bf16.mxu0 %v341_v0  ;;  %199 = vmatprep.mubr.msk.bf16.mxu0 %vm342_vm0, %v341_v0  ;;  %v45_v3 = vld [vmem:[#allocation2] sm:$0xff]  ;;  %v46_v4 = vld [vmem:[#allocation2 + $0x8] sm:$0xff]  ;;  %vm64_vm1 = vcmask 261120   ;;  %vm117_vm2 = vcmask 257024   ;;  %s343_s1 = smov [#allocation7]   ;;  %s344_s17 = smov 96  }
  0x2a   :  { %196 = vmatpush3.bf16.msra.mxu0 %v215_v1  ;;  %v47_v5 = vpack.c.bf16 %v46_v4, %v45_v3  ;;  %s141_s16 = sshll.u32 %s343_s1, 4  ;;  %s142_s16 = int_to_ptr.vmem [resolvable:$true] %s141_s16 }
  0x2b   :  { %197 = vmatprep.subr.bf16.mxu0 %v341_v0  ;;  %s261_s18 = scalar_lea.vmem %s142_s16, 128  ;;  %p266_p3 = scmp.lt.s32.totalorder %s142_s16, %s142_s16 }
  0x2c   :  { %p262_p2 = scmp.ne.s32.totalorder %s142_s16, %s261_s18  ;;  %p267_p4 = scmp.lt.s32.totalorder %s261_s18, %s261_s18 }
  0x2e   :  { %198 = vmatpush3.bf16.msra.mxu0 %v216_v2  ;;  %p268_p5 = por %p267_p4, %p266_p3 }
  0x30   :  { %p269_p6 = pnand %p268_p5, %p262_p2 }
  0x31   :  { %200 = vmatmul.mubr.msk.bf16.vlgmr.msra.gmra.mrb[0].mxu0 %vm64_vm1, %v47_v5 }
 0x104   :  { %v102_v6 = vpop.f32.mrb[0].mxu0 }
 0x105   :  { %v190_v7 = vpack.c.bf16 %v102_v6, %v102_v6  ;;  %v201_v8 = vpop.f32.mrb[1].mxu0 }
 0x106   :  { %v105_v9 = vpop.f32.mrb[2].mxu0 }
 0x107   :  { %v191_v10 = vpack.c.bf16 %v105_v9, %v105_v9  ;;  %128 = vrot.lane.b32.xlu1 %v190_v7, %s339_s0  ;;  %120 = vrot.lane.b32.xlu0 %v190_v7, %s344_s17  ;;  %v202_v11 = vpop.f32.mrb[3].mxu0  ;;  %118 = vst.msk [vmem:[#allocation7] sm:$0xf] %vm117_vm2, %v190_v7 }
 0x109   :  { %119 = vst.msk [vmem:[#allocation7 + $0x4] sm:$0xf] %vm117_vm2, %v191_v10 }
 0x10a   :  { %272 = shalt.err (!%p269_p6)
}
 0x10b   :  { %s273_s21 = scalar_lea.hbm %s461_s2, 128 }
 0x10c   :  { %p274_p7 = scmp.ne.s32.totalorder %s461_s2, %s273_s21  ;;  %p277_p8 = scmp.lt.u32.totalorder %s273_s21, %s461_s2 }
 0x10e   :  { %p279_p9 = pnand %p277_p8, %p274_p7 }
 0x110   :  { %282 = shalt.err (!%p279_p9)
}
 0x111   :  { %147 = dma.vmem_to_hbm [thread:$0]  %s142_s16, 128, %s461_s2, [#allocation4], %s339_s0, %s339_s0, %s340_s13  }
 0x112   :  { %130 = vrot.lane.b32.xlu1 %v191_v10, %s339_s0  ;;  %122 = vrot.lane.b32.xlu0 %v191_v10, %s344_s17  ;;  %s345_s28 = smov [#allocation8]   ;;  %s346_s30 = smov [#allocation10]  }
 0x113   :  { %s153_s29 = sshll.u32 %s345_s28, 4  ;;  %s165_s5 = sshll.u32 %s346_s30, 4  ;;  %s154_s29 = int_to_ptr.vmem [resolvable:$true] %s153_s29  ;;  %s420_s5 = int_to_ptr.vmem [resolvable:$true] %s165_s5 }
 0x114   :  { %s283_s2 = scalar_lea.vmem %s154_s29, 128  ;;  %p288_p11 = scmp.lt.s32.totalorder %s154_s29, %s154_s29 }
 0x115   :  { %p284_p10 = scmp.ne.s32.totalorder %s154_s29, %s283_s2  ;;  %p289_p12 = scmp.lt.s32.totalorder %s283_s2, %s283_s2 }
 0x117   :  { %p290_p13 = por %p289_p12, %p288_p11 }
 0x119   :  { %p291_p0 = pnand %p290_p13, %p284_p10 }
 0x179   :  { %v129_v12 = vpop.permute.xlu1 %128  ;;  %v121_v13 = vpop.permute.xlu0 %120 }
 0x17a   :  { %134 = vst.msk [vmem:[#allocation10] sm:$0xf] %vm117_vm2, %v129_v12  ;;  %126 = vst.msk [vmem:[#allocation8] sm:$0xf] %vm117_vm2, %v121_v13 }
 0x184   :  { %v131_v14 = vpop.permute.xlu1 %130  ;;  %v123_v15 = vpop.permute.xlu0 %122 }
 0x185   :  { %135 = vst.msk [vmem:[#allocation10 + $0x4] sm:$0xf] %vm117_vm2, %v131_v14  ;;  %127 = vst.msk [vmem:[#allocation8 + $0x4] sm:$0xf] %vm117_vm2, %v123_v15 }
 0x186   :  { %294 = shalt.err (!%p291_p0)
}
 0x187   :  { %s295_s8 = scalar_lea.hbm %s462_s3, 128 }
 0x188   :  { %p296_p1 = scmp.ne.s32.totalorder %s462_s3, %s295_s8  ;;  %p299_p2 = scmp.lt.u32.totalorder %s295_s8, %s462_s3 }
 0x18a   :  { %p301_p3 = pnand %p299_p2, %p296_p1 }
 0x18c   :  { %304 = shalt.err (!%p301_p3)
}
 0x18d   :  { %159 = dma.vmem_to_hbm [thread:$0]  %s154_s29, 128, %s462_s3, [#allocation9], %s339_s0, %s339_s0, %s340_s13  }
 0x18e   :  { %s305_s1 = scalar_lea.vmem %s420_s5, 128  ;;  %p310_p5 = scmp.lt.s32.totalorder %s420_s5, %s420_s5 }
 0x18f   :  { %p306_p4 = scmp.ne.s32.totalorder %s420_s5, %s305_s1  ;;  %p311_p6 = scmp.lt.s32.totalorder %s305_s1, %s305_s1 }
 0x191   :  { %p312_p7 = por %p311_p6, %p310_p5 }
 0x193   :  { %p313_p8 = pnand %p312_p7, %p306_p4 }
 0x195   :  { %316 = shalt.err (!%p313_p8)
}
 0x196   :  { %s317_s18 = scalar_lea.hbm %s463_s4, 128 }
 0x197   :  { %p318_p9 = scmp.ne.s32.totalorder %s463_s4, %s317_s18  ;;  %p321_p10 = scmp.lt.u32.totalorder %s317_s18, %s463_s4 }
 0x199   :  { %p323_p11 = pnand %p321_p10, %p318_p9 }
 0x19b   :  { %326 = shalt.err (!%p323_p11)
}
 0x19c   :  { %171 = dma.vmem_to_hbm [thread:$0]  %s420_s5, 128, %s463_s4, [#allocation9], %s339_s0, %s339_s0, %s340_s13  }
 0x19d   :  { %331 = dma.done.wait [#allocation4], 128  }
 0x19e   :  { %332 = vsyncadd [#allocation4], 4294967168 }
 0x19f   :  { %333 = dma.done.wait [#allocation9], 256  }
 0x1a0   :  { %334 = vsyncadd [#allocation9], 4294967040 }
 0x1a1   :  { %181 = vsyncpa [#allocation3], 1 }
 0x1a2   :  { %182 = vsyncpa [#allocation6], 1 }
 0x1a3   :  { %183 = vsyncpa [#allocation4], 1 }
 0x1a4   :  { %184 = vsyncpa [#allocation9], 1 }

</bundles_post_ra>
